<compile_context>
chip_gen: v6e
topology: v6e:2x2x1
jax: 0.10.0
libtpu: 0.0.40
codegen_flags: <defaults>
</compile_context>

<pallas_src>
import functools

import jax
import jax.numpy as jnp
from jax.experimental import pallas as pl
from jax.experimental.pallas import tpu as pltpu

EPSILON = 0.25      # TMDLayer default epsilon
NCLASS_PAD = 128    # lane-dense output width (sliced back to nclass in wrapper)


def _round_up(a, b):
    return (a + b - 1) // b * b


def _pick_tiles(n):
    """Row tile TM (parallel axis) and column tile TK (reduction axis) for adj."""
    if n <= 256:
        tm = _round_up(n, 128)
    elif n <= 1024:
        tm = _round_up((n + 1) // 2, 128)   # >=2 row tiles so both v7x cores get work
    else:
        tm = 512
    if n <= 2048:
        tk = _round_up(n, 128)              # single K step, minimal column padding
    elif n <= 8192:
        tk = 1024                           # 1 MiB bf16 tile
    else:
        tk = 2048                           # 2 MiB bf16 tile, 4 MiB double-buffered
    return tm, tk


# ----------------------------------------------------------------------------
# Pass 1 (no adj traffic): per-row-tile MLPs -> rhs_ext = d * [target | 1], target
# ----------------------------------------------------------------------------
def tmd_prep_kernel(x_ref, q_ref,
                    w1_ref, b1_ref,          # l1: Linear(nfeat -> nhid)
                    wp_ref, bp_ref,          # proj_list: Linear(nfeat -> nhid)
                    wpi1_ref, bpi1_ref,      # pi_list[0]: Linear(nhid -> nfeat)
                    wpi2_ref, bpi2_ref,      # pi_list[2]: Linear(nfeat -> 1) (row vec + SMEM bias)
                    rhs_ref, tgt_ref,        # outputs
                    *, n_real):
    i = pl.program_id(0)
    tm = tgt_ref.shape[0]
    nhid = tgt_ref.shape[1]

    x = x_ref[...]
    # target = relu(l1(x))
    tgt = jnp.maximum(
        jnp.dot(x, w1_ref[...], preferred_element_type=jnp.float32) + b1_ref[...],
        0.0)
    tgt_ref[...] = tgt

    # pi = sigmoid(Linear(relu(Linear(proj(x)))))
    xp = jnp.dot(x, wp_ref[...], preferred_element_type=jnp.float32) + bp_ref[...]
    h = jnp.maximum(
        jnp.dot(xp, wpi1_ref[...], preferred_element_type=jnp.float32) + bpi1_ref[...],
        0.0)
    # (nfeat -> 1) projection as VPU multiply + lane reduce (not a 1-column matmul).
    pi = jax.nn.sigmoid(
        jnp.sum(h * wpi2_ref[...], axis=1, keepdims=True) + bpi2_ref[0, 0])

    # d = pi / rowsum(adj)  (q precomputed in the wrapper, exact f32).
    d = pi / q_ref[...]
    # Zero d explicitly on padded rows (don't rely on zero-padded adj columns).
    row = i * tm + jax.lax.broadcasted_iota(jnp.int32, (tm, 1), 0)
    dm = jnp.where(row < n_real, d, 0.0)

    # rhs_ext = d * [target | 1]: one matmul in pass 2 yields both adj@(d*target)
    # and adj@d (the D_tilde diagonal).
    rhs_ref[:, 0:nhid] = dm * tgt
    rhs_ref[:, nhid:nhid + 1] = dm


# ----------------------------------------------------------------------------
# Pass 2: stream adj once -> acc += adj_tile @ rhs_ext, then residual + l2 + log_softmax
# ----------------------------------------------------------------------------
def tmd_main_kernel(adj_ref, rhs_ref, tgt_ref, w2_ref, b2_ref, dt_ref,
                    out_ref, acc_ref):
    k = pl.program_id(1)
    nk = pl.num_programs(1)
    nhid = acc_ref.shape[1] - 1

    @pl.when(k == 0)
    def _init():
        acc_ref[...] = jnp.zeros_like(acc_ref)

    a = adj_ref[...]
    # bf16 x bf16 -> f32 accumulation when adj is streamed in bf16 (default).
    acc_ref[...] += jnp.dot(a, rhs_ref[...].astype(a.dtype),
                            preferred_element_type=jnp.float32)

    @pl.when(k == nk - 1)
    def _finalize():
        acc = acc_ref[...]
        num = acc[:, 0:nhid]                # adj @ (d * target)
        den = acc[:, nhid:nhid + 1] + 1e-5  # adj @ d + 1e-5   (D_tilde diagonal)
        tgt = tgt_ref[...]                  # relu(l1(x)) for this row tile
        dt = dt_ref[0, 0]
        # target + dt * (L @ target), with L folded algebraically (no NxN L).
        t2 = (1.0 - dt) * tgt + (dt * (1.0 / EPSILON)) * (num / den)
        # TODO(synk): F.dropout is stochastic in training mode; identity (eval) here.
        logits = jnp.dot(t2, w2_ref[...], preferred_element_type=jnp.float32) + b2_ref[...]
        # Padded class lanes carry bias -1e30 -> exp underflows to 0, so the
        # 128-lane log_softmax equals the nclass-lane one on the real lanes,
        # while keeping the output store lane-dense (no masked vst).
        m = jnp.max(logits, axis=1, keepdims=True)
        sh = logits - m
        lse = jnp.log(jnp.sum(jnp.exp(sh), axis=1, keepdims=True))
        out_ref[...] = sh - lse


# ----------------------------------------------------------------------------
# Wrapper
# ----------------------------------------------------------------------------
def mlayer_forward(x, adj, params, *, use_bf16_adj=True):
    N, nfeat = x.shape
    nhid = params["w1"].shape[1]
    nclass = params["w2"].shape[1]

    f32 = jnp.float32
    adj_dtype = jnp.bfloat16 if use_bf16_adj else f32

    TM, TK = _pick_tiles(N)
    Np_r = _round_up(N, TM)                       # adj rows / tgt rows / output rows
    Np_c = _round_up(N, TK)                       # adj cols / rhs rows
    Np1 = _round_up(max(Np_r, Np_c), TM)          # pass-1 row coverage
    ni, nk, ni1 = Np_r // TM, Np_c // TK, Np1 // TM

    # q = rowsum(adj), exact f32 as in the reference.  Computed in the wrapper so
    # no Pallas pass streams adj just for a reduction; XLA can input-fuse this
    # with the single adj pad+cast below.
    q = jnp.sum(adj.astype(f32), axis=1, keepdims=True)

    # Single pad+cast of adj; skipped when already aligned and dtype matches.
    if N == Np_r and N == Np_c:
        adj_s = adj.astype(adj_dtype)
    else:
        adj_s = jnp.zeros((Np_r, Np_c), adj_dtype).at[:N, :N].set(adj.astype(adj_dtype))

    x_p = jnp.zeros((Np1, nfeat), f32).at[:N, :].set(x.astype(f32))
    q_p = jnp.ones((Np1, 1), f32).at[:N, :].set(q)   # padded rows get q=1 (d masked anyway)

    # Lane-dense output: pad l2 to 128 classes; padded bias = -1e30 so padded
    # columns contribute exp(.) = 0 to the softmax normalizer.
    w2p = jnp.zeros((nhid, NCLASS_PAD), f32).at[:, :nclass].set(params["w2"].astype(f32))
    b2p = jnp.full((1, NCLASS_PAD), -1e30, f32).at[:, :nclass].set(
        params["b2"].reshape(1, nclass).astype(f32))

    wpi2_row = params["wpi2"].reshape(1, nfeat).astype(f32)   # (nfeat, 1) -> (1, nfeat)
    bpi2 = params["bpi2"].reshape(1, 1).astype(f32)
    dt = params["dt"].reshape(1, 1).astype(f32)

    const1 = lambda i: (0, 0)
    const2 = lambda i, k: (0, 0)

    # ---- pass 1: small per-row-tile MLPs (x only, no adj) ----
    rhs_ext, tgt = pl.pallas_call(
        functools.partial(tmd_prep_kernel, n_real=N),
        grid=(ni1,),
        in_specs=[
            pl.BlockSpec((TM, nfeat), lambda i: (i, 0)),        # x row tile
            pl.BlockSpec((TM, 1), lambda i: (i, 0)),            # q row tile
            pl.BlockSpec((nfeat, nhid), const1),                # w1
            pl.BlockSpec((1, nhid), const1),                    # b1
            pl.BlockSpec((nfeat, nhid), const1),                # wp
            pl.BlockSpec((1, nhid), const1),                    # bp
            pl.BlockSpec((nhid, nfeat), const1),                # wpi1
            pl.BlockSpec((1, nfeat), const1),                   # bpi1
            pl.BlockSpec((1, nfeat), const1),                   # wpi2 (row vector)
            pl.BlockSpec(memory_space=pltpu.MemorySpace.SMEM),  # bpi2 scalar
        ],
        out_specs=[
            pl.BlockSpec((TM, nhid + 1), lambda i: (i, 0)),     # rhs_ext = d*[target|1]
            pl.BlockSpec((TM, nhid), lambda i: (i, 0)),         # target = relu(l1(x))
        ],
        out_shape=[
            jax.ShapeDtypeStruct((Np1, nhid + 1), f32),
            jax.ShapeDtypeStruct((Np1, nhid), f32),
        ],
        compiler_params=pltpu.CompilerParams(dimension_semantics=("parallel",)),
    )(x_p, q_p,
      params["w1"].astype(f32), params["b1"].reshape(1, nhid).astype(f32),
      params["wp"].astype(f32), params["bp"].reshape(1, nhid).astype(f32),
      params["wpi1"].astype(f32), params["bpi1"].reshape(1, nfeat).astype(f32),
      wpi2_row, bpi2)

    # ---- pass 2: single streamed read of adj + residual step + l2 + log_softmax ----
    out_pad = pl.pallas_call(
        tmd_main_kernel,
        grid=(ni, nk),
        in_specs=[
            pl.BlockSpec((TM, TK), lambda i, k: (i, k)),         # adj tile (bf16 by default)
            pl.BlockSpec((TK, nhid + 1), lambda i, k: (k, 0)),   # d*[target|1] rows for K tile
            pl.BlockSpec((TM, nhid), lambda i, k: (i, 0)),       # target rows for out tile
            pl.BlockSpec((nhid, NCLASS_PAD), const2),            # w2 (padded, lane-dense)
            pl.BlockSpec((1, NCLASS_PAD), const2),               # b2 (padded, -1e30 pad lanes)
            pl.BlockSpec(memory_space=pltpu.MemorySpace.SMEM),   # dt scalar
        ],
        out_specs=pl.BlockSpec((TM, NCLASS_PAD), lambda i, k: (i, 0)),
        out_shape=jax.ShapeDtypeStruct((Np_r, NCLASS_PAD), f32),
        scratch_shapes=[pltpu.VMEM((TM, nhid + 1), f32)],
        compiler_params=pltpu.CompilerParams(
            dimension_semantics=("parallel", "arbitrary"),
            vmem_limit_bytes=32 * 1024 * 1024,
        ),
    )(adj_s, rhs_ext, tgt, w2p, b2p, dt)

    return out_pad[:N, :nclass]


# ----------------------------------------------------------------------------
# Pure-JAX reference (mirrors the PyTorch module) and demo
# ----------------------------------------------------------------------------
def mlayer_reference(x, adj, params):
    n = x.shape[0]
    xp = x @ params["wp"] + params["bp"]
    h = jnp.maximum(xp @ params["wpi1"] + params["bpi1"], 0.0)
    pi = jax.nn.sigmoid(h @ params["wpi2"] + params["bpi2"])
    q = adj.sum(axis=1, keepdims=True)
    d = pi / q
    k_tilde = adj * d.reshape(1, n)
    row = k_tilde.sum(axis=1, keepdims=True) + 1e-5
    L = (1.0 / EPSILON) * (k_tilde / row) - jnp.eye(n, dtype=x.dtype)
    t = jnp.maximum(x @ params["w1"] + params["b1"], 0.0)
    t = t + params["dt"][0, 0] * (L @ t)
    logits = t @ params["w2"] + params["b2"]
    return jax.nn.log_softmax(logits, axis=1)


def _linear_init(kw, kb, fan_in, fan_out):
    """Deterministic PyTorch-style uniform(-1/sqrt(fan_in), 1/sqrt(fan_in)) init."""
    bound = 1.0 / float(fan_in) ** 0.5
    w = jax.random.uniform(kw, (fan_in, fan_out), jnp.float32, -bound, bound)
    b = jax.random.uniform(kb, (1, fan_out), jnp.float32, -bound, bound)
    return w, b


if __name__ == "__main__":
    n, nfeat, nhid, nclass = 8, 16, 32, 4  # MLayer(nfeat, nhid, nclass, dropout)

    key = jax.random.PRNGKey(0)
    keys = jax.random.split(key, 12)

    x = jax.random.normal(keys[0], (n, nfeat), jnp.float32)
    # Dense nonnegative adjacency (spmm(adj, I) == adj for dense input).
    adj = jax.random.uniform(keys[1], (n, n), jnp.float32, minval=0.1, maxval=1.0)

    wp, bp = _linear_init(keys[2], keys[3], nfeat, nhid)      # proj_list
    wpi1, bpi1 = _linear_init(keys[4], keys[5], nhid, nfeat)  # pi_list Linear 1
    wpi2, bpi2 = _linear_init(keys[6], keys[7], nfeat, 1)     # pi_list Linear 2
    w1, b1 = _linear_init(keys[8], keys[9], nfeat, nhid)      # l1
    w2, b2 = _linear_init(keys[10], keys[11], nhid, nclass)   # l2
    dt = jnp.array([[0.1]], jnp.float32)                      # TMDLayer.dt

    params = dict(wp=wp, bp=bp, wpi1=wpi1, bpi1=bpi1, wpi2=wpi2, bpi2=bpi2,
                  w1=w1, b1=b1, w2=w2, b2=b2, dt=dt)

    ref = mlayer_reference(x, adj, params)

    # Exact-precision path (f32-streamed adj): tight tolerance.
    out_f32 = mlayer_forward(x, adj, params, use_bf16_adj=False)
    jax.block_until_ready(out_f32)
    assert out_f32.shape == (n, nclass)
    assert bool(jnp.all(jnp.isfinite(out_f32)))
    assert bool(jnp.allclose(out_f32, ref, rtol=2e-3, atol=2e-3)), \
        float(jnp.max(jnp.abs(out_f32 - ref)))

    # Default path (bf16-streamed adj, f32 accumulation): looser tolerance from
    # adj quantization (~3 significant digits).
    out = mlayer_forward(x, adj, params)
    jax.block_until_ready(out)
    assert out.shape == (n, nclass)
    assert bool(jnp.all(jnp.isfinite(out)))
    assert bool(jnp.allclose(out, ref, rtol=3e-2, atol=3e-2)), \
        float(jnp.max(jnp.abs(out - ref)))

    print("KERNEL_OK")
</pallas_src>

<mosaic_0001>
module attributes {stable_mosaic.version = 11 : i64} {
  func.func @tmd_prep_kernel(%arg0: i32, %arg1: memref<128x16xf32, #tpu.memory_space<vmem>>, %arg2: memref<128x1xf32, #tpu.memory_space<vmem>>, %arg3: memref<16x32xf32, #tpu.memory_space<vmem>>, %arg4: memref<1x32xf32, #tpu.memory_space<vmem>>, %arg5: memref<16x32xf32, #tpu.memory_space<vmem>>, %arg6: memref<1x32xf32, #tpu.memory_space<vmem>>, %arg7: memref<32x16xf32, #tpu.memory_space<vmem>>, %arg8: memref<1x16xf32, #tpu.memory_space<vmem>>, %arg9: memref<1x16xf32, #tpu.memory_space<vmem>>, %arg10: memref<1x1xf32, #tpu.memory_space<smem>>, %arg11: memref<128x33xf32, #tpu.memory_space<vmem>>, %arg12: memref<128x32xf32, #tpu.memory_space<vmem>>) attributes {dimension_semantics = [#tpu.dimension_semantics<parallel>], iteration_bounds = array<i64: 1>, scalar_prefetch = 0 : i64, scratch_operands = 0 : i64, tpu.core_type = #tpu.core_type<tc>, window_params = [{transform_indices = @transform_0, window_bounds = array<i64: 128, 16>}, {transform_indices = @transform_1, window_bounds = array<i64: 128, 1>}, {pipeline_mode = #tpu.pipeline_mode<synchronous>, transform_indices = @transform_2, window_bounds = array<i64: 16, 32>}, {pipeline_mode = #tpu.pipeline_mode<synchronous>, transform_indices = @transform_3, window_bounds = array<i64: 1, 32>}, {pipeline_mode = #tpu.pipeline_mode<synchronous>, transform_indices = @transform_4, window_bounds = array<i64: 16, 32>}, {pipeline_mode = #tpu.pipeline_mode<synchronous>, transform_indices = @transform_5, window_bounds = array<i64: 1, 32>}, {pipeline_mode = #tpu.pipeline_mode<synchronous>, transform_indices = @transform_6, window_bounds = array<i64: 32, 16>}, {pipeline_mode = #tpu.pipeline_mode<synchronous>, transform_indices = @transform_7, window_bounds = array<i64: 1, 16>}, {pipeline_mode = #tpu.pipeline_mode<synchronous>, transform_indices = @transform_8, window_bounds = array<i64: 1, 16>}, {transform_indices = @transform_9, window_bounds = array<i64: 1, 1>}, {transform_indices = @transform_10, window_bounds = array<i64: 128, 33>}, {transform_indices = @transform_11, window_bounds = array<i64: 128, 32>}]} {
    %c0 = arith.constant 0 : index
    %c0_0 = arith.constant 0 : index
    %0 = vector.load %arg1[%c0, %c0_0] : memref<128x16xf32, #tpu.memory_space<vmem>>, vector<128x16xf32>
    %c0_1 = arith.constant 0 : index
    %c0_2 = arith.constant 0 : index
    %1 = vector.load %arg3[%c0_1, %c0_2] : memref<16x32xf32, #tpu.memory_space<vmem>>, vector<16x32xf32>
    %cst = arith.constant dense<0.000000e+00> : vector<128x32xf32>
    %2 = tpu.matmul %0, %1, %cst {dimension_numbers = #tpu.dot_dimension_numbers<[1], [0], [0], [1], [0, 0, 1, 1], [], []>} : vector<128x16xf32>, vector<16x32xf32>, vector<128x32xf32> -> vector<128x32xf32>
    %c0_3 = arith.constant 0 : index
    %c0_4 = arith.constant 0 : index
    %3 = vector.load %arg4[%c0_3, %c0_4] : memref<1x32xf32, #tpu.memory_space<vmem>>, vector<1x32xf32>
    %4 = vector.broadcast %3 : vector<1x32xf32> to vector<128x32xf32>
    %5 = arith.addf %2, %4 : vector<128x32xf32>
    %cst_5 = arith.constant 0.000000e+00 : f32
    %6 = vector.broadcast %cst_5 : f32 to vector<128x32xf32>
    %7 = arith.maximumf %5, %6 : vector<128x32xf32>
    %c0_6 = arith.constant 0 : index
    %c0_7 = arith.constant 0 : index
    %8 = vector.load %arg12[%c0_6, %c0_7] : memref<128x32xf32, #tpu.memory_space<vmem>>, vector<128x32xf32>
    tpu.vector_store %arg12[%c0_6, %c0_7], %7 {strides = array<i32>} : memref<128x32xf32, #tpu.memory_space<vmem>>, vector<128x32xf32>,
    %c0_8 = arith.constant 0 : index
    %c0_9 = arith.constant 0 : index
    %9 = vector.load %arg5[%c0_8, %c0_9] : memref<16x32xf32, #tpu.memory_space<vmem>>, vector<16x32xf32>
    %cst_10 = arith.constant dense<0.000000e+00> : vector<128x32xf32>
    %10 = tpu.matmul %0, %9, %cst_10 {dimension_numbers = #tpu.dot_dimension_numbers<[1], [0], [0], [1], [0, 0, 1, 1], [], []>} : vector<128x16xf32>, vector<16x32xf32>, vector<128x32xf32> -> vector<128x32xf32>
    %c0_11 = arith.constant 0 : index
    %c0_12 = arith.constant 0 : index
    %11 = vector.load %arg6[%c0_11, %c0_12] : memref<1x32xf32, #tpu.memory_space<vmem>>, vector<1x32xf32>
    %12 = vector.broadcast %11 : vector<1x32xf32> to vector<128x32xf32>
    %13 = arith.addf %10, %12 : vector<128x32xf32>
    %c0_13 = arith.constant 0 : index
    %c0_14 = arith.constant 0 : index
    %14 = vector.load %arg7[%c0_13, %c0_14] : memref<32x16xf32, #tpu.memory_space<vmem>>, vector<32x16xf32>
    %cst_15 = arith.constant dense<0.000000e+00> : vector<128x16xf32>
    %15 = tpu.matmul %13, %14, %cst_15 {dimension_numbers = #tpu.dot_dimension_numbers<[1], [0], [0], [1], [0, 0, 1, 1], [], []>} : vector<128x32xf32>, vector<32x16xf32>, vector<128x16xf32> -> vector<128x16xf32>
    %c0_16 = arith.constant 0 : index
    %c0_17 = arith.constant 0 : index
    %16 = vector.load %arg8[%c0_16, %c0_17] : memref<1x16xf32, #tpu.memory_space<vmem>>, vector<1x16xf32>
    %17 = vector.broadcast %16 : vector<1x16xf32> to vector<128x16xf32>
    %18 = arith.addf %15, %17 : vector<128x16xf32>
    %cst_18 = arith.constant 0.000000e+00 : f32
    %19 = vector.broadcast %cst_18 : f32 to vector<128x16xf32>
    %20 = arith.maximumf %18, %19 : vector<128x16xf32>
    %c0_19 = arith.constant 0 : index
    %c0_20 = arith.constant 0 : index
    %21 = vector.load %arg9[%c0_19, %c0_20] : memref<1x16xf32, #tpu.memory_space<vmem>>, vector<1x16xf32>
    %22 = vector.broadcast %21 : vector<1x16xf32> to vector<128x16xf32>
    %23 = arith.mulf %20, %22 : vector<128x16xf32>
    %cst_21 = arith.constant dense<0.000000e+00> : vector<128xf32>
    %24 = vector.multi_reduction <add>, %23, %cst_21 [1] : vector<128x16xf32> to vector<128xf32>
    %25 = vector.shape_cast %24 : vector<128xf32> to vector<128x1xf32>
    %c0_22 = arith.constant 0 : index
    %c0_23 = arith.constant 0 : index
    %26 = memref.load %arg10[%c0_22, %c0_23] : memref<1x1xf32, #tpu.memory_space<smem>>
    %27 = vector.broadcast %26 : f32 to vector<128x1xf32>
    %28 = arith.addf %25, %27 : vector<128x1xf32>
    %29 = arith.negf %28 : vector<128x1xf32>
    %30 = math.exp %29 : vector<128x1xf32>
    %cst_24 = arith.constant 1.000000e+00 : f32
    %31 = vector.broadcast %cst_24 : f32 to vector<128x1xf32>
    %32 = arith.addf %31, %30 : vector<128x1xf32>
    %33 = arith.divf %31, %32 : vector<128x1xf32>
    %c0_25 = arith.constant 0 : index
    %c0_26 = arith.constant 0 : index
    %34 = vector.load %arg2[%c0_25, %c0_26] : memref<128x1xf32, #tpu.memory_space<vmem>>, vector<128x1xf32>
    %35 = arith.divf %33, %34 : vector<128x1xf32>
    %c128_i32 = arith.constant 128 : i32
    %36 = arith.muli %arg0, %c128_i32 : i32
    %37 = tpu.iota {dimensions = array<i32: 0>} : vector<128x1xi32>
    %38 = vector.broadcast %36 : i32 to vector<128x1xi32>
    %39 = arith.addi %38, %37 : vector<128x1xi32>
    %c8_i32 = arith.constant 8 : i32
    %40 = vector.broadcast %c8_i32 : i32 to vector<128x1xi32>
    %41 = arith.cmpi slt, %39, %40 : vector<128x1xi32>
    %cst_27 = arith.constant 0.000000e+00 : f32
    %42 = vector.broadcast %cst_27 : f32 to vector<128x1xf32>
    %43 = arith.select %41, %35, %42 : vector<128x1xi1>, vector<128x1xf32>
    %44 = vector.broadcast %43 : vector<128x1xf32> to vector<128x32xf32>
    %45 = arith.mulf %44, %7 : vector<128x32xf32>
    %c0_28 = arith.constant 0 : index
    %c0_29 = arith.constant 0 : index
    %46 = vector.load %arg11[%c0_28, %c0_29] : memref<128x33xf32, #tpu.memory_space<vmem>>, vector<128x32xf32>
    tpu.vector_store %arg11[%c0_28, %c0_29], %45 {strides = array<i32>} : memref<128x33xf32, #tpu.memory_space<vmem>>, vector<128x32xf32>,
    %c0_30 = arith.constant 0 : index
    %c32 = arith.constant 32 : index
    %47 = vector.load %arg11[%c0_30, %c32] : memref<128x33xf32, #tpu.memory_space<vmem>>, vector<128x1xf32>
    tpu.vector_store %arg11[%c0_30, %c32], %43 {strides = array<i32>} : memref<128x33xf32, #tpu.memory_space<vmem>>, vector<128x1xf32>,
    return
  }
  func.func @transform_0(%arg0: i32) -> (i32, i32) {
    %c0_i32 = arith.constant 0 : i32
    %c0_i32_0 = arith.constant 0 : i32
    return %arg0, %c0_i32 : i32, i32
  }
  func.func @transform_1(%arg0: i32) -> (i32, i32) {
    %c0_i32 = arith.constant 0 : i32
    %c0_i32_0 = arith.constant 0 : i32
    return %arg0, %c0_i32 : i32, i32
  }
  func.func @transform_2(%arg0: i32) -> (i32, i32) {
    %c0_i32 = arith.constant 0 : i32
    %c0_i32_0 = arith.constant 0 : i32
    %c0_i32_1 = arith.constant 0 : i32
    return %c0_i32, %c0_i32_0 : i32, i32
  }
  func.func @transform_3(%arg0: i32) -> (i32, i32) {
    %c0_i32 = arith.constant 0 : i32
    %c0_i32_0 = arith.constant 0 : i32
    %c0_i32_1 = arith.constant 0 : i32
    return %c0_i32, %c0_i32_0 : i32, i32
  }
  func.func @transform_4(%arg0: i32) -> (i32, i32) {
    %c0_i32 = arith.constant 0 : i32
    %c0_i32_0 = arith.constant 0 : i32
    %c0_i32_1 = arith.constant 0 : i32
    return %c0_i32, %c0_i32_0 : i32, i32
  }
  func.func @transform_5(%arg0: i32) -> (i32, i32) {
    %c0_i32 = arith.constant 0 : i32
    %c0_i32_0 = arith.constant 0 : i32
    %c0_i32_1 = arith.constant 0 : i32
    return %c0_i32, %c0_i32_0 : i32, i32
  }
  func.func @transform_6(%arg0: i32) -> (i32, i32) {
    %c0_i32 = arith.constant 0 : i32
    %c0_i32_0 = arith.constant 0 : i32
    %c0_i32_1 = arith.constant 0 : i32
    return %c0_i32, %c0_i32_0 : i32, i32
  }
  func.func @transform_7(%arg0: i32) -> (i32, i32) {
    %c0_i32 = arith.constant 0 : i32
    %c0_i32_0 = arith.constant 0 : i32
    %c0_i32_1 = arith.constant 0 : i32
    return %c0_i32, %c0_i32_0 : i32, i32
  }
  func.func @transform_8(%arg0: i32) -> (i32, i32) {
    %c0_i32 = arith.constant 0 : i32
    %c0_i32_0 = arith.constant 0 : i32
    %c0_i32_1 = arith.constant 0 : i32
    return %c0_i32, %c0_i32_0 : i32, i32
  }
  func.func @transform_9(%arg0: i32) -> (i32, i32) {
    %c0_i32 = arith.constant 0 : i32
    %c0_i32_0 = arith.constant 0 : i32
    %c0_i32_1 = arith.constant 0 : i32
    return %c0_i32, %c0_i32_0 : i32, i32
  }
  func.func @transform_10(%arg0: i32) -> (i32, i32) {
    %c0_i32 = arith.constant 0 : i32
    %c0_i32_0 = arith.constant 0 : i32
    return %arg0, %c0_i32 : i32, i32
  }
  func.func @transform_11(%arg0: i32) -> (i32, i32) {
    %c0_i32 = arith.constant 0 : i32
    %c0_i32_0 = arith.constant 0 : i32
    return %arg0, %c0_i32 : i32, i32
  }
}

</mosaic_0001>

<bundles_post_ra>
// kernel: tpu_custom_call.1
= control target key start
LH: loop header
LB: loop body
LE: loop exit
PB: predicated region body
PF: predicated region fallthrough
CT: control target
= control target key end

     0   :  { %vm63_vm0 = vcmask 130048   ;;  %v1446_v3 = vmov 0   ;;  %v1447_v6 = vmov 0.0   ;;  %vm273_vm1 = vcmask 261120   ;;  %s1448_s18 = smov 32   ;;  %s1936_s2 = inlined_call_operand.vmem [shape: f32[16,32], index: 2, kind: input, shape index: {}]   ;;  %s1937_s0 = inlined_call_operand.vmem [shape: f32[128,16], index: 0, kind: input, shape index: {}]   ;;  %s1938_s4 = inlined_call_operand.vmem [shape: f32[16,32], index: 4, kind: input, shape index: {}]   ;;  %s1939_s6 = inlined_call_operand.vmem [shape: f32[32,16], index: 6, kind: input, shape index: {}]   ;;  %s1940_s3 = inlined_call_operand.vmem [shape: f32[1,32], index: 3, kind: input, shape index: {}]   ;;  %s1941_s11 = inlined_call_operand.vmem [shape: f32[128,32], index: 11, kind: output, shape index: {1}]   ;;  %s1942_s10 = inlined_call_operand.vmem [shape: f32[128,33], index: 10, kind: output, shape index: {0}]   ;;  %s1943_s5 = inlined_call_operand.vmem [shape: f32[1,32], index: 5, kind: input, shape index: {}]   ;;  %s1944_s7 = inlined_call_operand.vmem [shape: f32[1,16], index: 7, kind: input, shape index: {}]   ;;  %s1945_s8 = inlined_call_operand.vmem [shape: f32[1,16], index: 8, kind: input, shape index: {}]   ;;  %s1946_s9 = inlined_call_operand.<no memory space> [shape: f32[1,1], index: 9, kind: input, shape index: {}]   ;;  %s1947_s1 = inlined_call_operand.vmem [shape: f32[128,1], index: 1, kind: input, shape index: {}]  }
   0x1   :  { %v55_v0 = vld [vmem:[%s1936_s2 + $0x8] sm:$0xff]  ;;  %v54_v1 = vld [vmem:[%s1936_s2] sm:$0xff]  ;;  %1368 = vset.pattern.permute.xlu1 %v1446_v3  ;;  %v1534_v7 = vld [vmem:[%s1937_s0 + $0x50] sm:$0xff]  ;;  %1434 = vset.pattern.permute.xlu0 %v1446_v3  ;;  %vm1124_vm2 = vcmask 269568  }
   0x2   :  { %v1518_v2 = vld [vmem:[%s1937_s0 + $0x40] sm:$0xff]  ;;  %1361 = vmatprep.subr.mxu1 %v55_v0  ;;  %v1525_v4 = vld [vmem:[%s1937_s0 + $0x48] sm:$0xff]  ;;  %1370 = vperm.xlu1 %1368, %v1447_v6   ;;  %v49_v9 = vld [vmem:[%s1937_s0 + $0x58] sm:$0xff] }
   0x3   :  { %1289 = vmatprep.mubr.msk.f32.mxu1 %vm63_vm0, %v1518_v2  ;;  %1363 = vmatpush3.msra.mxu1 %v55_v0  ;;  %v291_v5 = vld [vmem:[%s1938_s4 + $0x8] sm:$0xff]  ;;  %v290_v8 = vld [vmem:[%s1938_s4] sm:$0xff]  ;;  %v52_v14 = vld [vmem:[%s1937_s0 + $0x70] sm:$0xff] }
   0x4   :  { %1362 = vmatprep.subr.mxu1 %v54_v1  ;;  %1273 = vmatprep.subr.mxu0 %v55_v0  ;;  %v50_v10 = vld [vmem:[%s1937_s0 + $0x60] sm:$0xff]  ;;  %v51_v12 = vld [vmem:[%s1937_s0 + $0x68] sm:$0xff]  ;;  %v53_v15 = vld [vmem:[%s1937_s0 + $0x78] sm:$0xff] }
   0x5   :  { %1364 = vmatpush3.msra.mxu1 %v54_v1  ;;  %1274 = vmatpush3.msra.mxu0 %v55_v0  ;;  %v38_v11 = vld [vmem:[%s1937_s0] sm:$0xff]  ;;  %v39_v13 = vld [vmem:[%s1937_s0 + $0x8] sm:$0xff]  ;;  %v40_v16 = vld [vmem:[%s1937_s0 + $0x10] sm:$0xff] }
   0x6   :  { %1290 = vmatmul.mubr.msk.f32.vlgmr.msra.gmra.mxu1 %vm63_vm0, %v1525_v4  ;;  %1301 = vmatprep.subr.mxu1 %v291_v5  ;;  %v41_v17 = vld [vmem:[%s1937_s0 + $0x18] sm:$0xff]  ;;  %v42_v18 = vld [vmem:[%s1937_s0 + $0x20] sm:$0xff]  ;;  %v43_v19 = vld [vmem:[%s1937_s0 + $0x28] sm:$0xff] }
   0x7   :  { %1302 = vmatpush3.msra.mxu1 %v291_v5  ;;  %1292 = vmatprep.mubr.msk.f32.mxu1 %vm63_vm0, %v1534_v7  ;;  %v447_v20 = vld [vmem:[%s1939_s6 + $0x18] sm:$0xff]  ;;  %v44_v21 = vld [vmem:[%s1937_s0 + $0x30] sm:$0xff]  ;;  %v445_v24 = vld [vmem:[%s1939_s6 + $0x8] sm:$0xff] }
   0x8   :  { %1303 = vmatprep.subr.mxu1 %v290_v8  ;;  %1375 = vperm.xlu1 %1368, %v1447_v6   ;;  %v446_v22 = vld [vmem:[%s1939_s6 + $0x10] sm:$0xff]  ;;  %v45_v23 = vld [vmem:[%s1937_s0 + $0x38] sm:$0xff]  ;;  %v444_v25 = vld [vmem:[%s1939_s6] sm:$0xff] }
   0x9   :  { %1304 = vmatpush3.msra.mxu1 %v290_v8  ;;  %1275 = vmatprep.subr.mxu0 %v54_v1  ;;  %v1644_v31 = vld [vmem:[%s1940_s3] ss:$0 sm:$0xff] }
   0xa   :  { %1293 = vmatmul.mubr.msk.f32.gmra.mxu1 %vm63_vm0, %v49_v9  ;;  %1276 = vmatpush3.msra.mxu0 %v54_v1 }
   0xb   :  { %1295 = vmatprep.mubr.msk.f32.mxu1 %vm63_vm0, %v50_v10  ;;  %1277 = vmatprep.mubr.msk.f32.mxu0 %vm63_vm0, %v38_v11 }
   0xc   :  { %1380 = vperm.xlu1 %1368, %v1447_v6   ;;  %1278 = vmatmul.mubr.msk.f32.vlgmr.msra.gmra.mxu0 %vm63_vm0, %v39_v13 }
   0xd   :  { %1280 = vmatprep.mubr.msk.f32.mxu0 %vm63_vm0, %v40_v16  ;;  %1329 = vmatprep.subr.mxu0 %v447_v20 }
   0xe   :  { %1296 = vmatmul.mubr.msk.f32.gmra.mxu1 %vm63_vm0, %v51_v12  ;;  %1330 = vmatpush3.msra.mxu0 %v447_v20 }
   0xf   :  { %1298 = vmatprep.mubr.msk.f32.mxu1 %vm63_vm0, %v52_v14  ;;  %1331 = vmatprep.subr.mxu0 %v446_v22 }
  0x10   :  { %1385 = vperm.xlu1 %1368, %v1447_v6   ;;  %1281 = vmatmul.mubr.msk.f32.gmra.mxu0 %vm63_vm0, %v41_v17 }
  0x11   :  { %1283 = vmatprep.mubr.msk.f32.mxu0 %vm63_vm0, %v42_v18  ;;  %1332 = vmatpush3.msra.mxu0 %v446_v22 }
  0x12   :  { %1299 = vmatmul.mubr.msk.f32.gmra.mxu1 %vm63_vm0, %v53_v15  ;;  %1333 = vmatprep.subr.mxu0 %v445_v24 }
  0x13   :  { %1305 = vmatprep.mubr.msk.f32.mxu1 %vm63_vm0, %v38_v11  ;;  %1334 = vmatpush3.msra.mxu0 %v445_v24 }
  0x14   :  { %1390 = vperm.xlu1 %1368, %v1447_v6   ;;  %1284 = vmatmul.mubr.msk.f32.gmra.mxu0 %vm63_vm0, %v43_v19 }
  0x15   :  { %1286 = vmatprep.mubr.msk.f32.mxu0 %vm63_vm0, %v44_v21  ;;  %1335 = vmatprep.subr.mxu0 %v444_v25 }
  0x16   :  { %1306 = vmatmul.mubr.msk.f32.vlgmr.msra.gmra.mxu1 %vm63_vm0, %v39_v13  ;;  %1336 = vmatpush3.msra.mxu0 %v444_v25 }
  0x17   :  { %1308 = vmatprep.mubr.msk.f32.mxu1 %vm63_vm0, %v40_v16 }
  0x18   :  { %1395 = vperm.xlu1 %1368, %v1447_v6   ;;  %1287 = vmatmul.mubr.msk.f32.gmra.mxu0 %vm63_vm0, %v45_v23 }
  0x1a   :  { %1309 = vmatmul.mubr.msk.f32.gmra.mxu1 %vm63_vm0, %v41_v17 }
  0x1b   :  { %1311 = vmatprep.mubr.msk.f32.mxu1 %vm63_vm0, %v42_v18  ;;  %v1730_v18 = vld [vmem:[%s1943_s5] ss:$0 sm:$0xff] }
  0x1c   :  { %1400 = vperm.xlu1 %1368, %v1447_v6  }
  0x1e   :  { %1312 = vmatmul.mubr.msk.f32.gmra.mxu1 %vm63_vm0, %v43_v19 }
  0x1f   :  { %1314 = vmatprep.mubr.msk.f32.mxu1 %vm63_vm0, %v44_v21 }
  0x20   :  { %1041 = vperm.xlu1 %1368, %v1447_v6  }
  0x22   :  { %1315 = vmatmul.mubr.msk.f32.gmra.mxu1 %vm63_vm0, %v45_v23 }
  0x23   :  { %1317 = vmatprep.mubr.msk.f32.mxu1 %vm63_vm0, %v1518_v2 }
  0x24   :  { %1405 = vrot.lane.b32.xlu1 %v1447_v6, %s1448_s18 }
  0x26   :  { %1318 = vmatmul.mubr.msk.f32.gmra.mxu1 %vm63_vm0, %v1525_v4 }
  0x27   :  { %1320 = vmatprep.mubr.msk.f32.mxu1 %vm63_vm0, %v1534_v7 }
  0x28   :  { %1410 = vrot.lane.b32.xlu1 %v1447_v6, %s1448_s18 }
  0x2a   :  { %1321 = vmatmul.mubr.msk.f32.gmra.mxu1 %vm63_vm0, %v49_v9 }
  0x2b   :  { %1323 = vmatprep.mubr.msk.f32.mxu1 %vm63_vm0, %v50_v10 }
  0x2c   :  { %1415 = vrot.lane.b32.xlu1 %v1447_v6, %s1448_s18 }
  0x2e   :  { %1324 = vmatmul.mubr.msk.f32.gmra.mxu1 %vm63_vm0, %v51_v12 }
  0x2f   :  { %1326 = vmatprep.mubr.msk.f32.mxu1 %vm63_vm0, %v52_v14 }
  0x30   :  { %1425 = vrot.lane.b32.xlu1 %v1447_v6, %s1448_s18 }
  0x32   :  { %1327 = vmatmul.mubr.msk.f32.gmra.mxu1 %vm63_vm0, %v53_v15 }
  0x7d   :  { %v1633_v26 = vpop.permute.xlu1 %1370 }
  0x7e   :  { %v1372_v46 = vunpack.i.l.bf16 %v1633_v26 }
  0x83   :  { %v1635_v27 = vpop.permute.xlu1 %1375 }
  0x84   :  { %v1377_v25 = vunpack.i.l.bf16 %v1635_v27 }
  0x87   :  { %v1637_v28 = vpop.permute.xlu1 %1380 }
  0x8b   :  { %v1639_v29 = vpop.permute.xlu1 %1385 }
  0x8c   :  { %v1388_v37 = vunpack.i.h.bf16 %v1639_v29 }
  0x8f   :  { %v1391_v30 = vpop.permute.xlu1 %1390 }
  0x90   :  { %v1392_v35 = vunpack.i.l.bf16 %v1391_v30  ;;  %v1393_v47 = vunpack.i.h.bf16 %v1391_v30 }
  0x93   :  { %v1396_v32 = vpop.permute.xlu1 %1395 }
  0x94   :  { %v1397_v44 = vunpack.i.l.bf16 %v1396_v32  ;;  %v1398_v61 = vunpack.i.h.bf16 %v1396_v32 }
  0x97   :  { %v1401_v45 = vpop.permute.xlu1 %1400 }
  0x98   :  { %v1402_v55 = vunpack.i.l.bf16 %v1401_v45  ;;  %v1403_v13 = vunpack.i.h.bf16 %v1401_v45 }
  0x9b   :  { %v1042_v11 = vpop.permute.xlu1 %1041 }
  0xc6   :  { %v1291_v33 = vpop.f32.mrf.mxu1 }
  0xc7   :  { %v224_v34 = vadd.f32 %v1291_v33, %v1644_v31  ;;  %v1373_v33 = vunpack.i.h.bf16 %v1633_v26 }
  0xc8   :  { %v218_v36 = vpop.f32.mrf.mxu1 }
  0xc9   :  { %v266_v38 = vmax.f32 %v224_v34, 0.0  ;;  %v219_v39 = vadd.f32 %v1644_v31, %v218_v36 }
  0xca   :  { %v1294_v40 = vpop.f32.mrf.mxu1 }
  0xcb   :  { %283 = vst.msk [vmem:[%s1941_s11 + $0x48] sm:$0xff] %vm273_vm1, %v266_v38  ;;  %v265_v41 = vmax.f32 %v219_v39, 0.0  ;;  %v1053_v42 = vmul.f32 %v1392_v35, %v266_v38  ;;  %v234_v43 = vadd.f32 %v1294_v40, %v1644_v31 }
  0xcc   :  { %v228_v48 = vpop.f32.mrf.mxu1  ;;  %v1279_v49 = vpop.f32.mrf.mxu0 }
  0xcd   :  { %282 = vst.msk [vmem:[%s1941_s11 + $0x40] sm:$0xff] %vm273_vm1, %v265_v41  ;;  %v1052_v50 = vmul.f32 %v1388_v37, %v265_v41  ;;  %1069 = vst.msk [vmem:[%s1942_s10 + $0x48] sm:$0xff] %vm273_vm1, %v1053_v42  ;;  %v268_v51 = vmax.f32 %v234_v43, 0.0  ;;  %v229_v52 = vadd.f32 %v1644_v31, %v228_v48  ;;  %v184_v53 = vadd.f32 %v1279_v49, %v1644_v31 }
  0xce   :  { %v1297_v54 = vpop.f32.mrf.mxu1  ;;  %v178_v56 = vpop.f32.mrf.mxu0  ;;  %v1382_v37 = vunpack.i.l.bf16 %v1637_v28  ;;  %v1378_v42 = vunpack.i.h.bf16 %v1635_v27 }
  0xcf   :  { %1068 = vst.msk [vmem:[%s1942_s10 + $0x40] sm:$0xff] %vm273_vm1, %v1052_v50  ;;  %285 = vst.msk [vmem:[%s1941_s11 + $0x58] sm:$0xff] %vm273_vm1, %v268_v51  ;;  %v267_v57 = vmax.f32 %v229_v52, 0.0  ;;  %v1055_v58 = vmul.f32 %v1397_v44, %v268_v51  ;;  %v244_v59 = vadd.f32 %v1297_v54, %v1644_v31  ;;  %v258_v60 = vmax.f32 %v184_v53, 0.0 }
  0xd0   :  { %v238_v62 = vpop.f32.mrf.mxu1  ;;  %v1675_v63 = vadd.f32 %v1644_v31, %v178_v56  ;;  %v1282_v24 = vpop.f32.mrf.mxu0  ;;  %v1383_v50 = vunpack.i.h.bf16 %v1637_v28 }
  0xd1   :  { %284 = vst.msk [vmem:[%s1941_s11 + $0x50] sm:$0xff] %vm273_vm1, %v267_v57  ;;  %v1054_v0 = vmul.f32 %v1393_v47, %v267_v57  ;;  %1071 = vst.msk [vmem:[%s1942_s10 + $0x58] sm:$0xff] %vm273_vm1, %v1055_v58  ;;  %v270_v1 = vmax.f32 %v244_v59, 0.0  ;;  %v239_v2 = vadd.f32 %v1644_v31, %v238_v62  ;;  %v1045_v3 = vmul.f32 %v1372_v46, %v258_v60 }
  0xd2   :  { %275 = vst.msk [vmem:[%s1941_s11 + $0x8] sm:$0xff] %vm273_vm1, %v258_v60  ;;  %v1300_v4 = vpop.f32.mrf.mxu1  ;;  %v257_v5 = vmax.f32 %v1675_v63, 0.0  ;;  %v194_v30 = vadd.f32 %v1282_v24, %v1644_v31  ;;  %v188_v32 = vpop.f32.mrf.mxu0  ;;  %v1387_v46 = vunpack.i.l.bf16 %v1639_v29 }
  0xd3   :  { %1070 = vst.msk [vmem:[%s1942_s10 + $0x50] sm:$0xff] %vm273_vm1, %v1054_v0  ;;  %287 = vst.msk [vmem:[%s1941_s11 + $0x68] sm:$0xff] %vm273_vm1, %v270_v1  ;;  %v269_v7 = vmax.f32 %v239_v2, 0.0  ;;  %v1057_v8 = vmul.f32 %v1402_v55, %v270_v1  ;;  %v254_v9 = vadd.f32 %v1300_v4, %v1644_v31  ;;  %v189_v35 = vadd.f32 %v1644_v31, %v188_v32 }
  0xd4   :  { %1061 = vst.msk [vmem:[%s1942_s10 + $0x8] sm:$0xff] %vm273_vm1, %v1045_v3  ;;  %v248_v10 = vpop.f32.mrf.mxu1  ;;  %274 = vst.msk [vmem:[%s1941_s11] sm:$0xff] %vm273_vm1, %v257_v5  ;;  %v260_v34 = vmax.f32 %v194_v30, 0.0  ;;  %v1285_v36 = vpop.f32.mrf.mxu0  ;;  %v1200_v30 = vld [vmem:[%s1945_s8] ss:$0 sm:$0xff] }
  0xd5   :  { %286 = vst.msk [vmem:[%s1941_s11 + $0x60] sm:$0xff] %vm273_vm1, %v269_v7  ;;  %v1056_v12 = vmul.f32 %v1398_v61, %v269_v7  ;;  %1073 = vst.msk [vmem:[%s1942_s10 + $0x68] sm:$0xff] %vm273_vm1, %v1057_v8  ;;  %v272_v14 = vmax.f32 %v254_v9, 0.0  ;;  %v249_v15 = vadd.f32 %v1644_v31, %v248_v10  ;;  %v259_v39 = vmax.f32 %v189_v35, 0.0 }
  0xd6   :  { %v1307_v16 = vpop.f32.mrf.mxu1  ;;  %277 = vst.msk [vmem:[%s1941_s11 + $0x18] sm:$0xff] %vm273_vm1, %v260_v34  ;;  %v1047_v38 = vmul.f32 %v1377_v25, %v260_v34  ;;  %v204_v40 = vadd.f32 %v1285_v36, %v1644_v31  ;;  %v198_v41 = vpop.f32.mrf.mxu0 }
  0xd7   :  { %1072 = vst.msk [vmem:[%s1942_s10 + $0x60] sm:$0xff] %vm273_vm1, %v1056_v12  ;;  %289 = vst.msk [vmem:[%s1941_s11 + $0x78] sm:$0xff] %vm273_vm1, %v272_v14  ;;  %v271_v17 = vmax.f32 %v249_v15, 0.0  ;;  %v1059_v19 = vmul.f32 %v1042_v11, %v272_v14  ;;  %v371_v23 = vadd.f32 %v1307_v16, %v1730_v18  ;;  %v1046_v26 = vmul.f32 %v1373_v33, %v259_v39 }
  0xd8   :  { %v365_v20 = vpop.f32.mrf.mxu1  ;;  %1063 = vst.msk [vmem:[%s1942_s10 + $0x18] sm:$0xff] %vm273_vm1, %v1047_v38  ;;  %276 = vst.msk [vmem:[%s1941_s11 + $0x10] sm:$0xff] %vm273_vm1, %v259_v39  ;;  %v262_v43 = vmax.f32 %v204_v40, 0.0  ;;  %v199_v44 = vadd.f32 %v1644_v31, %v198_v41  ;;  %v1288_v45 = vpop.f32.mrf.mxu0 }
  0xd9   :  { %288 = vst.msk [vmem:[%s1941_s11 + $0x70] sm:$0xff] %vm273_vm1, %v271_v17  ;;  %v1058_v21 = vmul.f32 %v1403_v13, %v271_v17  ;;  %1075 = vst.msk [vmem:[%s1942_s10 + $0x78] sm:$0xff] %vm273_vm1, %v1059_v19  ;;  %v366_v22 = vadd.f32 %v1730_v18, %v365_v20  ;;  %v214_v48 = vadd.f32 %v1288_v45, %v1644_v31 }
  0xda   :  { %1062 = vst.msk [vmem:[%s1942_s10 + $0x10] sm:$0xff] %vm273_vm1, %v1046_v26  ;;  %279 = vst.msk [vmem:[%s1941_s11 + $0x28] sm:$0xff] %vm273_vm1, %v262_v43  ;;  %v1049_v27 = vmul.f32 %v1382_v37, %v262_v43  ;;  %v261_v47 = vmax.f32 %v199_v44, 0.0  ;;  %v208_v49 = vpop.f32.mrf.mxu0  ;;  %v1310_v54 = vpop.f32.mrf.mxu1 }
  0xdb   :  { %1074 = vst.msk [vmem:[%s1942_s10 + $0x70] sm:$0xff] %vm273_vm1, %v1058_v21  ;;  %1337 = vmatprep.mubr.msk.f32.mxu0 %vm273_vm1, %v366_v22  ;;  %v264_v51 = vmax.f32 %v214_v48, 0.0  ;;  %v209_v52 = vadd.f32 %v1644_v31, %v208_v49  ;;  %v381_v55 = vadd.f32 %v1310_v54, %v1730_v18 }
  0xdc   :  { %1338 = vmatmul.mubr.msk.f32.vlgmr.msra.gmra.mxu0 %vm273_vm1, %v371_v23  ;;  %1065 = vst.msk [vmem:[%s1942_s10 + $0x28] sm:$0xff] %vm273_vm1, %v1049_v27  ;;  %278 = vst.msk [vmem:[%s1941_s11 + $0x20] sm:$0xff] %vm273_vm1, %v261_v47  ;;  %v1048_v29 = vmul.f32 %v1378_v42, %v261_v47  ;;  %v375_v56 = vpop.f32.mrf.mxu1  ;;  %v1183_v23 = vld [vmem:[%s1944_s7] ss:$0 sm:$0xff]  ;;  %v736_v27 = vstv %s1946_s9 }
  0xdd   :  { %281 = vst.msk [vmem:[%s1941_s11 + $0x38] sm:$0xff] %vm273_vm1, %v264_v51  ;;  %v1051_v28 = vmul.f32 %v1387_v46, %v264_v51  ;;  %v263_v53 = vmax.f32 %v209_v52, 0.0  ;;  %v376_v57 = vadd.f32 %v1730_v18, %v375_v56 }
  0xde   :  { %1064 = vst.msk [vmem:[%s1942_s10 + $0x20] sm:$0xff] %vm273_vm1, %v1048_v29  ;;  %v1313_v58 = vpop.f32.mrf.mxu1 }
  0xdf   :  { %1067 = vst.msk [vmem:[%s1942_s10 + $0x38] sm:$0xff] %vm273_vm1, %v1051_v28  ;;  %280 = vst.msk [vmem:[%s1941_s11 + $0x30] sm:$0xff] %vm273_vm1, %v263_v53  ;;  %v1050_v31 = vmul.f32 %v1383_v50, %v263_v53  ;;  %1340 = vmatprep.mubr.msk.f32.mxu0 %vm273_vm1, %v376_v57  ;;  %v391_v59 = vadd.f32 %v1313_v58, %v1730_v18  ;;  %v1406_v50 = vpop.permute.xlu1 %1405 }
  0xe0   :  { %v385_v60 = vpop.f32.mrf.mxu1  ;;  %1341 = vmatmul.mubr.msk.f32.gmra.mxu0 %vm273_vm1, %v381_v55  ;;  %v1408_v29 = vunpack.i.h.bf16 %v1406_v50  ;;  %v1407_v51 = vunpack.i.l.bf16 %v1406_v50 }
  0xe1   :  { %1066 = vst.msk [vmem:[%s1942_s10 + $0x30] sm:$0xff] %vm273_vm1, %v1050_v31  ;;  %v386_v61 = vadd.f32 %v1730_v18, %v385_v60  ;;  %v849_v60 = vld [vmem:[%s1947_s1] sm:$0xff] }
  0xe2   :  { %v1316_v62 = vpop.f32.mrf.mxu1  ;;  %1126 = vst.msk [vmem:[%s1942_s10 + $0x8] sm:$0xff] %vm1124_vm2, %v1407_v51  ;;  %1127 = vst.msk [vmem:[%s1942_s10 + $0x10] sm:$0xff] %vm1124_vm2, %v1408_v29 }
  0xe3   :  { %1343 = vmatprep.mubr.msk.f32.mxu0 %vm273_vm1, %v386_v61  ;;  %v401_v0 = vadd.f32 %v1316_v62, %v1730_v18  ;;  %v1411_v31 = vpop.permute.xlu1 %1410 }
  0xe4   :  { %v395_v1 = vpop.f32.mrf.mxu1  ;;  %1344 = vmatmul.mubr.msk.f32.gmra.mxu0 %vm273_vm1, %v391_v59  ;;  %v1413_v54 = vunpack.i.h.bf16 %v1411_v31  ;;  %v1412_v55 = vunpack.i.l.bf16 %v1411_v31 }
  0xe5   :  { %v396_v2 = vadd.f32 %v1730_v18, %v395_v1 }
  0xe6   :  { %v1319_v3 = vpop.f32.mrf.mxu1  ;;  %1128 = vst.msk [vmem:[%s1942_s10 + $0x18] sm:$0xff] %vm1124_vm2, %v1412_v55  ;;  %1129 = vst.msk [vmem:[%s1942_s10 + $0x20] sm:$0xff] %vm1124_vm2, %v1413_v54 }
  0xe7   :  { %1346 = vmatprep.mubr.msk.f32.mxu0 %vm273_vm1, %v396_v2  ;;  %v411_v4 = vadd.f32 %v1319_v3, %v1730_v18  ;;  %v1416_v59 = vpop.permute.xlu1 %1415 }
  0xe8   :  { %v405_v7 = vpop.f32.mrf.mxu1  ;;  %1347 = vmatmul.mubr.msk.f32.gmra.mxu0 %vm273_vm1, %v401_v0  ;;  %v1418_v61 = vunpack.i.h.bf16 %v1416_v59  ;;  %v1417_v62 = vunpack.i.l.bf16 %v1416_v59 }
  0xe9   :  { %v406_v8 = vadd.f32 %v1730_v18, %v405_v7 }
  0xea   :  { %v1322_v9 = vpop.f32.mrf.mxu1  ;;  %1130 = vst.msk [vmem:[%s1942_s10 + $0x28] sm:$0xff] %vm1124_vm2, %v1417_v62  ;;  %1131 = vst.msk [vmem:[%s1942_s10 + $0x30] sm:$0xff] %vm1124_vm2, %v1418_v61 }
  0xeb   :  { %1349 = vmatprep.mubr.msk.f32.mxu0 %vm273_vm1, %v406_v8  ;;  %v421_v10 = vadd.f32 %v1322_v9, %v1730_v18  ;;  %v1426_v2 = vpop.permute.xlu1 %1425 }
  0xec   :  { %v415_v11 = vpop.f32.mrf.mxu1  ;;  %1350 = vmatmul.mubr.msk.f32.gmra.mxu0 %vm273_vm1, %v411_v4  ;;  %v1428_v3 = vunpack.i.h.bf16 %v1426_v2  ;;  %v1427_v4 = vunpack.i.l.bf16 %v1426_v2 }
  0xed   :  { %v416_v12 = vadd.f32 %v1730_v18, %v415_v11 }
  0xee   :  { %v1325_v13 = vpop.f32.mrf.mxu1  ;;  %1134 = vst.msk [vmem:[%s1942_s10 + $0x48] sm:$0xff] %vm1124_vm2, %v1427_v4  ;;  %1135 = vst.msk [vmem:[%s1942_s10 + $0x50] sm:$0xff] %vm1124_vm2, %v1428_v3 }
  0xef   :  { %1352 = vmatprep.mubr.msk.f32.mxu0 %vm273_vm1, %v416_v12  ;;  %v431_v14 = vadd.f32 %v1325_v13, %v1730_v18 }
  0xf0   :  { %v425_v15 = vpop.f32.mrf.mxu1  ;;  %1353 = vmatmul.mubr.msk.f32.gmra.mxu0 %vm273_vm1, %v421_v10 }
  0xf1   :  { %v426_v16 = vadd.f32 %v1730_v18, %v425_v15 }
  0xf2   :  { %v1328_v17 = vpop.f32.mrf.mxu1 }
  0xf3   :  { %1355 = vmatprep.mubr.msk.f32.mxu0 %vm273_vm1, %v426_v16  ;;  %v441_v19 = vadd.f32 %v1328_v17, %v1730_v18 }
  0xf4   :  { %v435_v20 = vpop.f32.mrf.mxu1  ;;  %1356 = vmatmul.mubr.msk.f32.gmra.mxu0 %vm273_vm1, %v431_v14 }
  0xf5   :  { %v436_v21 = vadd.f32 %v1730_v18, %v435_v20 }
  0xf7   :  { %1358 = vmatprep.mubr.msk.f32.mxu0 %vm273_vm1, %v436_v21 }
  0xf8   :  { %1359 = vmatmul.mubr.msk.f32.gmra.mxu0 %vm273_vm1, %v441_v19 }
 0x19c   :  { %v1339_v22 = vpop.f32.mrf.mxu0 }
 0x19e   :  { %v569_v24 = vpop.f32.mrf.mxu0 }
 0x19f   :  { %v570_v25 = vadd.f32 %v1183_v23, %v569_v24 }
 0x1a0   :  { %v1342_v18 = vpop.f32.mrf.mxu0 }
 0x1a1   :  { %v648_v32 = vmax.f32 %v570_v25, 0.0 }
 0x1a2   :  { %v579_v35 = vpop.f32.mrf.mxu0 }
 0x1a3   :  { %v671_v33 = vmul.f32 %v1200_v30, %v648_v32 }
 0x1a4   :  { %v1345_v36 = vpop.f32.mrf.mxu0 }
 0x1a5   :  { %v687_v34 = vsel %vm63_vm0, %v671_v33, 0.0 }
 0x1a6   :  { %688 = vadd.xlane.f32.xlu0 %v687_v34  ;;  %v589_v37 = vpop.f32.mrf.mxu0 }
 0x1a8   :  { %v1348_v38 = vpop.f32.mrf.mxu0 }
 0x1aa   :  { %v599_v39 = vpop.f32.mrf.mxu0 }
 0x1ac   :  { %v1351_v40 = vpop.f32.mrf.mxu0 }
 0x1ae   :  { %v609_v41 = vpop.f32.mrf.mxu0 }
 0x1b0   :  { %v1354_v42 = vpop.f32.mrf.mxu0 }
 0x1b2   :  { %v619_v26 = vpop.f32.mrf.mxu0 }
 0x1b4   :  { %v1357_v43 = vpop.f32.mrf.mxu0 }
 0x1b6   :  { %v629_v44 = vpop.f32.mrf.mxu0 }
 0x1b8   :  { %v1360_v45 = vpop.f32.mrf.mxu0 }
 0x1ba   :  { %v639_v46 = vpop.f32.mrf.mxu0 }
 0x1bc   :  { %1420 = vrot.lane.b32.xlu0 %v1447_v6, %s1448_s18 }
 0x1c0   :  { %1430 = vrot.lane.b32.xlu0 %v1447_v6, %s1448_s18 }
 0x22f   :  { %v689_v47 = vpop.xlane.xlu0 %688 }
 0x230   :  { %v737_v48 = vadd.f32 %v736_v27, %v689_v47 }
 0x232   :  { %v1201_v49 = vmul.f32 -1.442695, %v737_v48 }
 0x233   :  { %v1421_v52 = vpop.permute.xlu0 %1420 }
 0x234   :  { %1440 = vpow2.f32 %v1201_v49  ;;  %v1423_v28 = vunpack.i.h.bf16 %v1421_v52  ;;  %v1422_v53 = vunpack.i.l.bf16 %v1421_v52 }
 0x235   :  { %1442 = vrcp.f32 %v849_v60 }
 0x236   :  { %1133 = vst.msk [vmem:[%s1942_s10 + $0x40] sm:$0xff] %vm1124_vm2, %v1423_v28  ;;  %1132 = vst.msk [vmem:[%s1942_s10 + $0x38] sm:$0xff] %vm1124_vm2, %v1422_v53 }
 0x237   :  { %v1431_v56 = vpop.permute.xlu0 %1430 }
 0x238   :  { %v1433_v57 = vunpack.i.h.bf16 %v1431_v56  ;;  %v1432_v58 = vunpack.i.l.bf16 %v1431_v56 }
 0x23a   :  { %1137 = vst.msk [vmem:[%s1942_s10 + $0x60] sm:$0xff] %vm1124_vm2, %v1433_v57  ;;  %1136 = vst.msk [vmem:[%s1942_s10 + $0x58] sm:$0xff] %vm1124_vm2, %v1432_v58 }
 0x241   :  { %v1441_v0 = vpop.eup %1440 }
 0x242   :  { %v801_v1 = vadd.f32 1.0, %v1441_v0  ;;  %v1443_v7 = vpop.eup %1442 }
 0x244   :  { %1444 = vrcp.f32 %v801_v1 }
 0x251   :  { %v1445_v8 = vpop.eup %1444 }
 0x252   :  { %v866_v9 = vmul.f32 %v1445_v8, %v1443_v7 }
 0x254   :  { %1076 = vrot.lane.b32.xlu1 %v866_v9, %s1448_s18  ;;  %966 = vperm.xlu0 %1434, %v866_v9  }
 0x258   :  { %1436 = vrot.lane.b32.xlu1 %v1447_v6, %s1448_s18  ;;  %1106 = vrot.lane.b32.xlu0 %v1447_v6, %s1448_s18 }
 0x2c6   :  { %v1077_v10 = vpop.permute.xlu1 %1076 }
 0x2ca   :  { %v1437_v11 = vpop.permute.xlu1 %1436 }
 0x2cb   :  { %v1439_v12 = vunpack.i.h.bf16 %v1437_v11  ;;  %v1438_v13 = vunpack.i.l.bf16 %v1437_v11 }
 0x2cd   :  { %1139 = vst.msk [vmem:[%s1942_s10 + $0x70] sm:$0xff] %vm1124_vm2, %v1439_v12  ;;  %1138 = vst.msk [vmem:[%s1942_s10 + $0x68] sm:$0xff] %vm1124_vm2, %v1438_v13 }
 0x2cf   :  { %v967_v14 = vpop.permute.xlu0 %966 }
 0x2d0   :  { %v1044_v15 = vmul.f32 %v967_v14, %v257_v5 }
 0x2d2   :  { %1060 = vst.msk [vmem:[%s1942_s10] sm:$0xff] %vm273_vm1, %v1044_v15 }
 0x2d3   :  { %1125 = vst.msk [vmem:[%s1942_s10] sm:$0xff] %vm1124_vm2, %v1077_v10  ;;  %v1107_v6 = vpop.permute.xlu0 %1106 }
 0x2d4   :  { %1140 = vst.msk [vmem:[%s1942_s10 + $0x78] sm:$0xff] %vm1124_vm2, %v1107_v6 }

</bundles_post_ra>
